<compile_context>
chip_gen: v5e
topology: v5e:2x2
jax: 0.10.0
libtpu: 0.0.40
codegen_flags: <defaults>
</compile_context>

<pallas_src>
import jax
import jax.numpy as jnp
from jax import lax
from jax.experimental import pallas as pl
from jax.experimental.pallas import tpu as pltpu


def _actor_pi_kernel(x_ref, w1_ref, b1_ref, w2_ref, b2_ref, w3_ref, b3_ref,
                     out_ref):
    """Transposed ('batch-on-lanes') MLP + softmax for one batch tile.

    Shapes inside the kernel:
      x_ref  : [TB, input_size]            (natural layout, batch on sublanes)
      wN_ref : [out_features, in_features] (PyTorch layout, VMEM-resident)
      bN_ref : [out_features, 1]
      out_ref: [out_size, TB]              (batch on the 128-lane axis)
    """
    x = x_ref[...]                                   # [TB, in]

    # Layer 1: h1^T = W1 @ x^T + b1.  The transpose of x is folded into the
    # matmul by contracting both operands' last dims (MXU trans_b path).
    dn_nt = (((1,), (1,)), ((), ()))                 # contract lhs.-1 with rhs.-1
    pre1 = lax.dot_general(w1_ref[...], x, dn_nt,
                           preferred_element_type=jnp.float32) + b1_ref[...]
    # bf16 tanh: native bf16 EUP on v6e/v7x (~2x), emulated (neutral) on v5e.
    h1 = jnp.tanh(pre1.astype(jnp.bfloat16)).astype(jnp.float32)   # [neu, TB]

    # Layer 2: Linear + Tanh (standard W @ h matmul in the transposed layout).
    pre2 = jnp.dot(w2_ref[...], h1,
                   preferred_element_type=jnp.float32) + b2_ref[...]
    h2 = jnp.tanh(pre2.astype(jnp.bfloat16)).astype(jnp.float32)   # [neu, TB]

    # Layer 3: logits, still transposed: [out_size, TB].
    logits = (jnp.dot(w3_ref[...], h2, preferred_element_type=jnp.float32)
              + b3_ref[...])

    # Numerically stable softmax over the action axis (= sublane axis 0):
    # cheap sublane reductions, lane-dense elementwise work, dense store.
    # Exact divide so every valid column sums to 1 to f32 rounding.
    m = jnp.max(logits, axis=0, keepdims=True)
    e = jnp.exp(logits - m)
    denom = jnp.sum(e, axis=0, keepdims=True)
    out_ref[...] = (e / denom).astype(out_ref.dtype)


def _round_up(n, m):
    return ((n + m - 1) // m) * m


def _choose_tb(B):
    """Batch tile (lane axis).  Big tiles amortize per-step overhead; for
    large batches keep >= 2 grid steps so v7x megacore can shard them."""
    b_up = _round_up(max(B, 1), 128)
    if b_up <= 256:
        return b_up                       # single small tile
    tb = _round_up(pl.cdiv(B, 2), 128)    # >= 2 grid steps
    return max(128, min(tb, 8192))        # cap tile at 8192 lanes (~0.5 MiB x)


@jax.jit
def actor_pi(x, w1, b1, w2, b2, w3, b3):
    """x: [B, input_size] float32 -> action probabilities [B, out_size].

    w1: [neu, input], b1: [neu], w2: [neu, neu], b2: [neu],
    w3: [out, neu],   b3: [out]   (PyTorch nn.Linear layout).
    """
    B, input_size = x.shape
    neu_size = w1.shape[0]
    out_size = w3.shape[0]

    TB = _choose_tb(B)
    grid = (pl.cdiv(B, TB),)              # ragged last tile handled by masking

    # Column-vector biases for the transposed formulation (tiny reshapes).
    b1c = b1.reshape(neu_size, 1)
    b2c = b2.reshape(neu_size, 1)
    b3c = b3.reshape(out_size, 1)

    resident = lambda shape: pl.BlockSpec(shape, lambda i: (0, 0))

    cost = pl.CostEstimate(
        flops=2 * B * (input_size * neu_size
                       + neu_size * neu_size
                       + neu_size * out_size),
        transcendentals=B * (2 * neu_size + out_size),
        bytes_accessed=4 * (B * input_size                         # x
                            + neu_size * input_size + neu_size
                            + neu_size * neu_size + neu_size
                            + out_size * neu_size + out_size
                            + B * out_size),                       # out
    )

    probs_t = pl.pallas_call(
        _actor_pi_kernel,
        out_shape=jax.ShapeDtypeStruct((out_size, B), jnp.float32),
        grid=grid,
        in_specs=[
            pl.BlockSpec((TB, input_size), lambda i: (i, 0)),      # x tile
            resident((neu_size, input_size)),                      # w1 (VMEM-resident)
            resident((neu_size, 1)),                               # b1
            resident((neu_size, neu_size)),                        # w2
            resident((neu_size, 1)),                               # b2
            resident((out_size, neu_size)),                        # w3
            resident((out_size, 1)),                               # b3
        ],
        out_specs=pl.BlockSpec((out_size, TB), lambda i: (0, i)),
        compiler_params=pltpu.CompilerParams(
            dimension_semantics=("parallel",)),                    # megacore on v7x
        cost_estimate=cost,
    )(x, w1, b1c, w2, b2c, w3, b3c)

    # One tiny XLA transpose back to natural [B, out_size] layout.
    return probs_t.T


def init_actor_params(key, input_size, neu_size, out_size):
    """Deterministic init mimicking nn.Linear's U(-1/sqrt(fan_in), +...),
    stored in PyTorch layout W: [out_features, in_features], b: [out_features]."""
    ks = jax.random.split(key, 6)

    def linear(kw, kb, fan_in, fan_out):
        bound = 1.0 / jnp.sqrt(jnp.float32(fan_in))
        w = jax.random.uniform(kw, (fan_out, fan_in), jnp.float32,
                               minval=-bound, maxval=bound)
        b = jax.random.uniform(kb, (fan_out,), jnp.float32,
                               minval=-bound, maxval=bound)
        return w, b

    w1, b1 = linear(ks[0], ks[1], input_size, neu_size)
    w2, b2 = linear(ks[2], ks[3], neu_size, neu_size)
    w3, b3 = linear(ks[4], ks[5], neu_size, out_size)
    return w1, b1, w2, b2, w3, b3


def actor_pi_ref(x, w1, b1, w2, b2, w3, b3):
    """Pure-JAX f32 reference (matches PyTorch nn.Linear: y = x @ W^T + b)."""
    h1 = jnp.tanh(x @ w1.T + b1)
    h2 = jnp.tanh(h1 @ w2.T + b2)
    logits = h2 @ w3.T + b3
    return jax.nn.softmax(logits, axis=-1)


if __name__ == "__main__":
    key = jax.random.PRNGKey(0)
    k_x, k_x2, k_p = jax.random.split(key, 3)

    input_size = 16
    neu_size = 32
    out_size = 8
    params = init_actor_params(k_p, input_size, neu_size, out_size)

    # Small batch (as a single Actor.pi call over a handful of states).
    batch = 8
    x = jax.random.normal(k_x, (batch, input_size), jnp.float32)
    probs = jax.block_until_ready(actor_pi(x, *params))
    ref = actor_pi_ref(x, *params)
    assert probs.shape == (batch, out_size)
    # bf16 tanh (EUP optimization) -> small approximation vs the f32 reference.
    assert jnp.allclose(probs, ref, atol=1e-2, rtol=1e-2), "mismatch vs reference"
    # Exact softmax divide -> rows sum to 1 to f32 rounding.
    assert jnp.allclose(jnp.sum(probs, axis=-1), 1.0, atol=1e-5), "rows must sum to 1"

    # Larger, non-tile-aligned batch to exercise the multi-tile grid and the
    # edge-block masking path (no explicit padding anywhere).
    batch2 = 300
    x2 = jax.random.normal(k_x2, (batch2, input_size), jnp.float32)
    probs2 = jax.block_until_ready(actor_pi(x2, *params))
    ref2 = actor_pi_ref(x2, *params)
    assert probs2.shape == (batch2, out_size)
    assert jnp.allclose(probs2, ref2, atol=1e-2, rtol=1e-2), "mismatch vs reference (batched)"
    assert jnp.allclose(jnp.sum(probs2, axis=-1), 1.0, atol=1e-5), "rows must sum to 1 (batched)"
    assert bool(jnp.all(jnp.isfinite(probs))) and bool(jnp.all(jnp.isfinite(probs2)))

    print("KERNEL_OK")
</pallas_src>

<mosaic_0001>
module attributes {stable_mosaic.version = 11 : i64} {
  func.func @_actor_pi_kernel(%arg0: i32, %arg1: memref<128x16xf32, #tpu.memory_space<vmem>>, %arg2: memref<32x16xf32, #tpu.memory_space<vmem>>, %arg3: memref<32x1xf32, #tpu.memory_space<vmem>>, %arg4: memref<32x32xf32, #tpu.memory_space<vmem>>, %arg5: memref<32x1xf32, #tpu.memory_space<vmem>>, %arg6: memref<8x32xf32, #tpu.memory_space<vmem>>, %arg7: memref<8x1xf32, #tpu.memory_space<vmem>>, %arg8: memref<8x128xf32, #tpu.memory_space<vmem>>) attributes {dimension_semantics = [#tpu.dimension_semantics<parallel>], iteration_bounds = array<i64: 1>, scalar_prefetch = 0 : i64, scratch_operands = 0 : i64, tpu.core_type = #tpu.core_type<tc>, window_params = [{transform_indices = @transform_0, window_bounds = array<i64: 128, 16>}, {pipeline_mode = #tpu.pipeline_mode<synchronous>, transform_indices = @transform_1, window_bounds = array<i64: 32, 16>}, {pipeline_mode = #tpu.pipeline_mode<synchronous>, transform_indices = @transform_2, window_bounds = array<i64: 32, 1>}, {pipeline_mode = #tpu.pipeline_mode<synchronous>, transform_indices = @transform_3, window_bounds = array<i64: 32, 32>}, {pipeline_mode = #tpu.pipeline_mode<synchronous>, transform_indices = @transform_4, window_bounds = array<i64: 32, 1>}, {pipeline_mode = #tpu.pipeline_mode<synchronous>, transform_indices = @transform_5, window_bounds = array<i64: 8, 32>}, {pipeline_mode = #tpu.pipeline_mode<synchronous>, transform_indices = @transform_6, window_bounds = array<i64: 8, 1>}, {transform_indices = @transform_7, window_bounds = array<i64: 8, 128>}]} {
    %c0 = arith.constant 0 : index
    %c0_0 = arith.constant 0 : index
    %0 = vector.load %arg1[%c0, %c0_0] : memref<128x16xf32, #tpu.memory_space<vmem>>, vector<128x16xf32>
    %c0_1 = arith.constant 0 : index
    %c0_2 = arith.constant 0 : index
    %1 = vector.load %arg2[%c0_1, %c0_2] : memref<32x16xf32, #tpu.memory_space<vmem>>, vector<32x16xf32>
    %cst = arith.constant dense<0.000000e+00> : vector<32x128xf32>
    %2 = tpu.matmul %1, %0, %cst {dimension_numbers = #tpu.dot_dimension_numbers<[1], [1], [0], [0], [0, 0, 1, 0], [], []>} : vector<32x16xf32>, vector<128x16xf32>, vector<32x128xf32> -> vector<32x128xf32>
    %c0_3 = arith.constant 0 : index
    %c0_4 = arith.constant 0 : index
    %3 = vector.load %arg3[%c0_3, %c0_4] : memref<32x1xf32, #tpu.memory_space<vmem>>, vector<32x1xf32>
    %4 = vector.broadcast %3 : vector<32x1xf32> to vector<32x128xf32>
    %5 = arith.addf %2, %4 : vector<32x128xf32>
    %6 = arith.truncf %5 : vector<32x128xf32> to vector<32x128xbf16>
    %7 = math.tanh %6 : vector<32x128xbf16>
    %8 = arith.extf %7 : vector<32x128xbf16> to vector<32x128xf32>
    %c0_5 = arith.constant 0 : index
    %c0_6 = arith.constant 0 : index
    %9 = vector.load %arg4[%c0_5, %c0_6] : memref<32x32xf32, #tpu.memory_space<vmem>>, vector<32x32xf32>
    %cst_7 = arith.constant dense<0.000000e+00> : vector<32x128xf32>
    %10 = tpu.matmul %9, %8, %cst_7 {dimension_numbers = #tpu.dot_dimension_numbers<[1], [0], [0], [1], [0, 0, 1, 1], [], []>} : vector<32x32xf32>, vector<32x128xf32>, vector<32x128xf32> -> vector<32x128xf32>
    %c0_8 = arith.constant 0 : index
    %c0_9 = arith.constant 0 : index
    %11 = vector.load %arg5[%c0_8, %c0_9] : memref<32x1xf32, #tpu.memory_space<vmem>>, vector<32x1xf32>
    %12 = vector.broadcast %11 : vector<32x1xf32> to vector<32x128xf32>
    %13 = arith.addf %10, %12 : vector<32x128xf32>
    %14 = arith.truncf %13 : vector<32x128xf32> to vector<32x128xbf16>
    %15 = math.tanh %14 : vector<32x128xbf16>
    %16 = arith.extf %15 : vector<32x128xbf16> to vector<32x128xf32>
    %c0_10 = arith.constant 0 : index
    %c0_11 = arith.constant 0 : index
    %17 = vector.load %arg6[%c0_10, %c0_11] : memref<8x32xf32, #tpu.memory_space<vmem>>, vector<8x32xf32>
    %cst_12 = arith.constant dense<0.000000e+00> : vector<8x128xf32>
    %18 = tpu.matmul %17, %16, %cst_12 {dimension_numbers = #tpu.dot_dimension_numbers<[1], [0], [0], [1], [0, 0, 1, 1], [], []>} : vector<8x32xf32>, vector<32x128xf32>, vector<8x128xf32> -> vector<8x128xf32>
    %c0_13 = arith.constant 0 : index
    %c0_14 = arith.constant 0 : index
    %19 = vector.load %arg7[%c0_13, %c0_14] : memref<8x1xf32, #tpu.memory_space<vmem>>, vector<8x1xf32>
    %20 = vector.broadcast %19 : vector<8x1xf32> to vector<8x128xf32>
    %21 = arith.addf %18, %20 : vector<8x128xf32>
    %cst_15 = arith.constant dense<0xFF800000> : vector<128xf32>
    %22 = vector.multi_reduction <maximumf>, %21, %cst_15 [0] : vector<8x128xf32> to vector<128xf32>
    %23 = vector.shape_cast %22 : vector<128xf32> to vector<1x128xf32>
    %24 = vector.broadcast %23 : vector<1x128xf32> to vector<8x128xf32>
    %25 = arith.subf %21, %24 : vector<8x128xf32>
    %26 = math.exp %25 : vector<8x128xf32>
    %cst_16 = arith.constant dense<0.000000e+00> : vector<128xf32>
    %27 = vector.multi_reduction <add>, %26, %cst_16 [0] : vector<8x128xf32> to vector<128xf32>
    %28 = vector.shape_cast %27 : vector<128xf32> to vector<1x128xf32>
    %29 = vector.broadcast %28 : vector<1x128xf32> to vector<8x128xf32>
    %30 = arith.divf %26, %29 : vector<8x128xf32>
    %c0_17 = arith.constant 0 : index
    %c0_18 = arith.constant 0 : index
    %31 = vector.load %arg8[%c0_17, %c0_18] : memref<8x128xf32, #tpu.memory_space<vmem>>, vector<8x128xf32>
    tpu.vector_store %arg8[%c0_17, %c0_18], %30 {strides = array<i32>} : memref<8x128xf32, #tpu.memory_space<vmem>>, vector<8x128xf32>,
    return
  }
  func.func @transform_0(%arg0: i32) -> (i32, i32) {
    %c0_i32 = arith.constant 0 : i32
    %c0_i32_0 = arith.constant 0 : i32
    return %arg0, %c0_i32 : i32, i32
  }
  func.func @transform_1(%arg0: i32) -> (i32, i32) {
    %c0_i32 = arith.constant 0 : i32
    %c0_i32_0 = arith.constant 0 : i32
    %c0_i32_1 = arith.constant 0 : i32
    return %c0_i32, %c0_i32_0 : i32, i32
  }
  func.func @transform_2(%arg0: i32) -> (i32, i32) {
    %c0_i32 = arith.constant 0 : i32
    %c0_i32_0 = arith.constant 0 : i32
    %c0_i32_1 = arith.constant 0 : i32
    return %c0_i32, %c0_i32_0 : i32, i32
  }
  func.func @transform_3(%arg0: i32) -> (i32, i32) {
    %c0_i32 = arith.constant 0 : i32
    %c0_i32_0 = arith.constant 0 : i32
    %c0_i32_1 = arith.constant 0 : i32
    return %c0_i32, %c0_i32_0 : i32, i32
  }
  func.func @transform_4(%arg0: i32) -> (i32, i32) {
    %c0_i32 = arith.constant 0 : i32
    %c0_i32_0 = arith.constant 0 : i32
    %c0_i32_1 = arith.constant 0 : i32
    return %c0_i32, %c0_i32_0 : i32, i32
  }
  func.func @transform_5(%arg0: i32) -> (i32, i32) {
    %c0_i32 = arith.constant 0 : i32
    %c0_i32_0 = arith.constant 0 : i32
    %c0_i32_1 = arith.constant 0 : i32
    return %c0_i32, %c0_i32_0 : i32, i32
  }
  func.func @transform_6(%arg0: i32) -> (i32, i32) {
    %c0_i32 = arith.constant 0 : i32
    %c0_i32_0 = arith.constant 0 : i32
    %c0_i32_1 = arith.constant 0 : i32
    return %c0_i32, %c0_i32_0 : i32, i32
  }
  func.func @transform_7(%arg0: i32) -> (i32, i32) {
    %c0_i32 = arith.constant 0 : i32
    %c0_i32_0 = arith.constant 0 : i32
    return %c0_i32, %arg0 : i32, i32
  }
}

</mosaic_0001>

<bundles_post_ra>
// kernel: actor_pi.1
= control target key start
LH: loop header
LB: loop body
LE: loop exit
PB: predicated region body
PF: predicated region fallthrough
CT: control target
= control target key end

     0   :  { %vm70_vm0 = vcmask 130048   ;;  %v392_v10 = vmov 0   ;;  %vm204_vm1 = vcmask 261120   ;;  %s579_s0 = inlined_call_operand.vmem [shape: f32[8,16], index: 0, kind: input, shape index: {}]   ;;  %s580_s2 = inlined_call_operand.vmem [shape: f32[32,1], index: 2, kind: input, shape index: {}]   ;;  %s581_s4 = inlined_call_operand.vmem [shape: f32[32,1], index: 4, kind: input, shape index: {}]   ;;  %s582_s1 = inlined_call_operand.vmem [shape: f32[32,16], index: 1, kind: input, shape index: {}]   ;;  %s583_s3 = inlined_call_operand.vmem [shape: f32[32,32], index: 3, kind: input, shape index: {}]   ;;  %s584_s6 = inlined_call_operand.vmem [shape: f32[8,1], index: 6, kind: input, shape index: {}]   ;;  %s585_s5 = inlined_call_operand.vmem [shape: f32[8,32], index: 5, kind: input, shape index: {}]   ;;  %s586_s7 = inlined_call_operand.vmem [shape: f32[8,8], index: 7, kind: output, shape index: {}]  }
   0x1   :  { %v41_v0 = vld [vmem:[%s579_s0 + $0x78] sm:$0xff]  ;;  %v40_v1 = vld [vmem:[%s579_s0 + $0x70] sm:$0xff]  ;;  %v39_v2 = vld [vmem:[%s579_s0 + $0x68] sm:$0xff]  ;;  %370 = vset.pattern.permute.xlu1 %v392_v10  ;;  %369 = vset.pattern.permute.xlu0 %v392_v10 }
   0x2   :  { %352 = vmatpush.xpose.msk.msra.mxu3 %vm70_vm0, %v41_v0  ;;  %327 = vmatpush.xpose.msk.msra.mxu0 %vm70_vm0, %v41_v0  ;;  %v38_v3 = vld [vmem:[%s579_s0 + $0x60] sm:$0xff]  ;;  %v37_v4 = vld [vmem:[%s579_s0 + $0x58] sm:$0xff]  ;;  %v36_v5 = vld [vmem:[%s579_s0 + $0x50] sm:$0xff] }
   0x3   :  { %v35_v6 = vld [vmem:[%s579_s0 + $0x48] sm:$0xff]  ;;  %v34_v7 = vld [vmem:[%s579_s0 + $0x40] sm:$0xff]  ;;  %v33_v8 = vld [vmem:[%s579_s0 + $0x38] sm:$0xff]  ;;  %371 = vset.pattern.permute.xlu2 %v392_v10 }
   0x4   :  { %v32_v9 = vld [vmem:[%s579_s0 + $0x30] sm:$0xff]  ;;  %v31_v11 = vld [vmem:[%s579_s0 + $0x28] sm:$0xff]  ;;  %v46_v13 = vld [vmem:[%s580_s2] sm:$0xff] }
   0x5   :  { %v48_v12 = vld [vmem:[%s580_s2 + $0x10] sm:$0xff]  ;;  %v30_v14 = vld [vmem:[%s579_s0 + $0x20] sm:$0xff]  ;;  %52 = vperm.xlu1 %370, %v46_v13   ;;  %v29_v15 = vld [vmem:[%s579_s0 + $0x18] sm:$0xff] }
   0x6   :  { %353 = vmatpush.xpose.msk.msra.mxu3 %vm70_vm0, %v40_v1  ;;  %328 = vmatpush.xpose.msk.msra.mxu0 %vm70_vm0, %v40_v1  ;;  %v49_v16 = vld [vmem:[%s580_s2 + $0x18] sm:$0xff]  ;;  %v47_v17 = vld [vmem:[%s580_s2 + $0x8] sm:$0xff]  ;;  %v28_v18 = vld [vmem:[%s579_s0 + $0x10] sm:$0xff] }
   0x7   :  { %62 = vperm.xlu0 %369, %v48_v12   ;;  %v27_v19 = vld [vmem:[%s579_s0 + $0x8] sm:$0xff]  ;;  %v180_v20 = vld [vmem:[%s581_s4] sm:$0xff]  ;;  %v44_v25 = vld [vmem:[%s582_s1 + $0x10] sm:$0xff] }
   0x8   :  { %v181_v21 = vld [vmem:[%s581_s4 + $0x8] sm:$0xff]  ;;  %v26_v22 = vld [vmem:[%s579_s0] sm:$0xff]  ;;  %v45_v26 = vld [vmem:[%s582_s1 + $0x18] sm:$0xff] }
   0x9   :  { %v43_v23 = vld [vmem:[%s582_s1 + $0x8] sm:$0xff]  ;;  %v42_v24 = vld [vmem:[%s582_s1] sm:$0xff]  ;;  %v182_v46 = vld [vmem:[%s581_s4 + $0x10] sm:$0xff] }
   0xa   :  { %354 = vmatpush.xpose.msk.msra.mxu3 %vm70_vm0, %v39_v2  ;;  %329 = vmatpush.xpose.msk.msra.mxu0 %vm70_vm0, %v39_v2  ;;  %v176_v49 = vld [vmem:[%s583_s3] sm:$0xff]  ;;  %v183_v51 = vld [vmem:[%s581_s4 + $0x18] sm:$0xff]  ;;  %v177_v52 = vld [vmem:[%s583_s3 + $0x8] sm:$0xff] }
   0xb   :  { %196 = vperm.xlu2 %371, %v182_v46   ;;  %v263_v53 = vld [vmem:[%s584_s6] sm:$0xff]  ;;  %v178_v54 = vld [vmem:[%s583_s3 + $0x10] sm:$0xff]  ;;  %v179_v55 = vld [vmem:[%s583_s3 + $0x18] sm:$0xff] }
   0xc   :  { %v262_v13 = vld [vmem:[%s585_s5] sm:$0xff] }
   0xd   :  { %57 = vperm.xlu1 %370, %v47_v17  }
   0xe   :  { %355 = vmatpush.xpose.msk.msra.mxu3 %vm70_vm0, %v38_v3  ;;  %330 = vmatpush.xpose.msk.msra.mxu0 %vm70_vm0, %v38_v3 }
   0xf   :  { %67 = vperm.xlu0 %369, %v49_v16  }
  0x12   :  { %356 = vmatpush.xpose.msk.msra.mxu3 %vm70_vm0, %v37_v4  ;;  %331 = vmatpush.xpose.msk.msra.mxu0 %vm70_vm0, %v37_v4 }
  0x13   :  { %201 = vperm.xlu2 %371, %v183_v51  }
  0x15   :  { %191 = vperm.xlu1 %370, %v181_v21  }
  0x16   :  { %357 = vmatpush.xpose.msk.msra.mxu3 %vm70_vm0, %v36_v5  ;;  %332 = vmatpush.xpose.msk.msra.mxu0 %vm70_vm0, %v36_v5 }
  0x17   :  { %186 = vperm.xlu0 %369, %v180_v20  }
  0x1a   :  { %358 = vmatpush.xpose.msk.msra.mxu3 %vm70_vm0, %v35_v6  ;;  %333 = vmatpush.xpose.msk.msra.mxu0 %vm70_vm0, %v35_v6 }
  0x1b   :  { %266 = vperm.xlu2 %371, %v263_v53  }
  0x1e   :  { %359 = vmatpush.xpose.msk.msra.mxu3 %vm70_vm0, %v34_v7  ;;  %334 = vmatpush.xpose.msk.msra.mxu0 %vm70_vm0, %v34_v7 }
  0x22   :  { %360 = vmatpush.xpose.msk.msra.mxu3 %vm70_vm0, %v33_v8  ;;  %335 = vmatpush.xpose.msk.msra.mxu0 %vm70_vm0, %v33_v8 }
  0x26   :  { %361 = vmatpush.xpose.msk.msra.mxu3 %vm70_vm0, %v32_v9  ;;  %336 = vmatpush.xpose.msk.msra.mxu0 %vm70_vm0, %v32_v9 }
  0x2a   :  { %362 = vmatpush.xpose.msk.msra.mxu3 %vm70_vm0, %v31_v11  ;;  %337 = vmatpush.xpose.msk.msra.mxu0 %vm70_vm0, %v31_v11 }
  0x2e   :  { %363 = vmatpush.xpose.msk.msra.mxu3 %vm70_vm0, %v30_v14  ;;  %338 = vmatpush.xpose.msk.msra.mxu0 %vm70_vm0, %v30_v14 }
  0x32   :  { %364 = vmatpush.xpose.msk.msra.mxu3 %vm70_vm0, %v29_v15  ;;  %339 = vmatpush.xpose.msk.msra.mxu0 %vm70_vm0, %v29_v15 }
  0x36   :  { %365 = vmatpush.xpose.msk.msra.mxu3 %vm70_vm0, %v28_v18  ;;  %340 = vmatpush.xpose.msk.msra.mxu0 %vm70_vm0, %v28_v18 }
  0x3a   :  { %366 = vmatpush.xpose.msk.msra.mxu3 %vm70_vm0, %v27_v19  ;;  %341 = vmatpush.xpose.msk.msra.mxu0 %vm70_vm0, %v27_v19 }
  0x3e   :  { %367 = vmatpush.xpose.msk.msra.mxu3 %vm70_vm0, %v26_v22  ;;  %342 = vmatpush.xpose.msk.msra.mxu0 %vm70_vm0, %v26_v22 }
  0x41   :  { %344 = vmatmul.msk.f32.vlgmr.msra.gmra.mxu3 %vm70_vm0, %v43_v23  ;;  %343 = vmatmul.msk.f32.vlgmr.msra.gmra.mxu0 %vm70_vm0, %v42_v24 }
  0x49   :  { %345 = vmatmul.msk.f32.gmra.mxu3 %vm70_vm0, %v44_v25 }
  0x51   :  { %346 = vmatmul.msk.f32.gmra.mxu3 %vm70_vm0, %v45_v26 }
  0x65   :  { %v197_v58 = vpop.permute.xlu2 %196 }
  0x6d   :  { %v202_v61 = vpop.permute.xlu2 %201 }
  0x75   :  { %v267_v15 = vpop.permute.xlu2 %266 }
  0x77   :  { %v53_v28 = vpop.permute.xlu1 %52 }
  0x79   :  { %v63_v29 = vpop.permute.xlu0 %62 }
  0x7f   :  { %v58_v31 = vpop.permute.xlu1 %57 }
  0x81   :  { %v68_v33 = vpop.permute.xlu0 %67 }
  0x87   :  { %v192_v60 = vpop.permute.xlu1 %191 }
  0x89   :  { %v187_v0 = vpop.permute.xlu0 %186 }
  0xbe   :  { %v148_v32 = vpop.f32.mrf.mxu0 }
  0xbf   :  { %v149_v34 = vadd.f32 %v148_v32, %v53_v28 }
  0xc4   :  { %v151_v27 = vpop.f32.mrf.mxu3 }
  0xc5   :  { %v152_v35 = vadd.f32 %v151_v27, %v58_v31 }
  0xc7   :  { %v160_v40 = vpack.c.bf16 %v152_v35, %v149_v34 }
  0xc9   :  { %v163_v43 = vunpack.c.h.bf16 %v160_v40  ;;  %v162_v44 = vunpack.c.l.bf16 %v160_v40 }
  0xcc   :  { %v154_v30 = vpop.f32.mrf.mxu3 }
  0xcd   :  { %v155_v37 = vadd.f32 %v154_v30, %v63_v29 }
  0xd4   :  { %v157_v36 = vpop.f32.mrf.mxu3 }
  0xd5   :  { %v158_v38 = vadd.f32 %v157_v36, %v68_v33 }
  0xd7   :  { %v161_v39 = vpack.c.bf16 %v158_v38, %v155_v37 }
  0xd9   :  { %v165_v41 = vunpack.c.h.bf16 %v161_v39  ;;  %v164_v42 = vunpack.c.l.bf16 %v161_v39 }
  0xdb   :  { %372 = vtanh.f32 %v165_v41 }
  0xdc   :  { %374 = vtanh.f32 %v164_v42 }
  0xdd   :  { %376 = vtanh.f32 %v163_v43 }
  0xde   :  { %378 = vtanh.f32 %v162_v44 }
  0xe1   :  { %v373_v45 = vpop.eup %372 }
  0xe2   :  { %229 = vmatpush.msra.mxu1 %v373_v45  ;;  %v375_v47 = vpop.eup %374 }
  0xe3   :  { %v377_v48 = vpop.eup %376 }
  0xe4   :  { %230 = vmatpush.msra.mxu1 %v375_v47  ;;  %v379_v50 = vpop.eup %378 }
  0xe6   :  { %231 = vmatpush.msra.mxu1 %v377_v48 }
  0xe8   :  { %232 = vmatpush.msra.mxu1 %v379_v50 }
  0xe9   :  { %347 = vmatmul.msk.f32.vlgmr.msra.gmra.mxu1 %vm204_vm1, %v176_v49 }
  0xf1   :  { %348 = vmatmul.msk.f32.gmra.mxu1 %vm204_vm1, %v177_v52 }
  0xf9   :  { %349 = vmatmul.msk.f32.gmra.mxu1 %vm204_vm1, %v178_v54 }
 0x101   :  { %350 = vmatmul.msk.f32.gmra.mxu1 %vm204_vm1, %v179_v55 }
 0x166   :  { %v234_v56 = vpop.f32.mrf.mxu1 }
 0x167   :  { %v235_v3 = vadd.f32 %v234_v56, %v187_v0 }
 0x16e   :  { %v237_v57 = vpop.f32.mrf.mxu1 }
 0x16f   :  { %v238_v62 = vadd.f32 %v237_v57, %v192_v60 }
 0x171   :  { %v246_v5 = vpack.c.bf16 %v238_v62, %v235_v3 }
 0x173   :  { %v249_v8 = vunpack.c.h.bf16 %v246_v5  ;;  %v248_v9 = vunpack.c.l.bf16 %v246_v5 }
 0x176   :  { %v240_v59 = vpop.f32.mrf.mxu1 }
 0x177   :  { %v241_v1 = vadd.f32 %v240_v59, %v197_v58 }
 0x17e   :  { %v243_v63 = vpop.f32.mrf.mxu1 }
 0x17f   :  { %v244_v2 = vadd.f32 %v243_v63, %v202_v61 }
 0x181   :  { %v247_v4 = vpack.c.bf16 %v244_v2, %v241_v1 }
 0x183   :  { %v251_v6 = vunpack.c.h.bf16 %v247_v4  ;;  %v250_v7 = vunpack.c.l.bf16 %v247_v4 }
 0x185   :  { %380 = vtanh.f32 %v251_v6 }
 0x186   :  { %382 = vtanh.f32 %v250_v7 }
 0x187   :  { %384 = vtanh.f32 %v249_v8 }
 0x188   :  { %386 = vtanh.f32 %v248_v9 }
 0x18b   :  { %v381_v10 = vpop.eup %380 }
 0x18c   :  { %284 = vmatpush.msra.mxu2 %v381_v10  ;;  %v383_v11 = vpop.eup %382 }
 0x18d   :  { %v385_v12 = vpop.eup %384 }
 0x18e   :  { %285 = vmatpush.msra.mxu2 %v383_v11  ;;  %v387_v14 = vpop.eup %386 }
 0x190   :  { %286 = vmatpush.msra.mxu2 %v385_v12 }
 0x192   :  { %287 = vmatpush.msra.mxu2 %v387_v14 }
 0x193   :  { %351 = vmatmul.msk.f32.vlgmr.msra.gmra.mxu2 %vm204_vm1, %v262_v13 }
 0x216   :  { %v289_v16 = vpop.f32.mrf.mxu2 }
 0x217   :  { %v290_v17 = vadd.f32 %v289_v16, %v267_v15 }
 0x219   :  { %v292_v18 = vrot.slane %v290_v17, 4 }
 0x21b   :  { %v293_v19 = vmax.f32 %v290_v17, %v292_v18 }
 0x21d   :  { %v294_v20 = vrot.slane %v293_v19, 2 }
 0x21f   :  { %v295_v21 = vmax.f32 %v293_v19, %v294_v20 }
 0x221   :  { %v296_v22 = vrot.slane %v295_v21, 1 }
 0x223   :  { %v297_v23 = vmax.f32 %v295_v21, %v296_v22 }
 0x225   :  { %v298_v24 = vsub.f32 %v290_v17, %v297_v23 }
 0x227   :  { %v299_v25 = vmul.f32 1.442695, %v298_v24 }
 0x229   :  { %388 = vpow2.f32 %v299_v25 }
 0x22f   :  { %v389_v26 = vpop.eup %388 }
 0x230   :  { %v301_v27 = vrot.slane %v389_v26, 4 }
 0x232   :  { %v302_v28 = vadd.f32 %v389_v26, %v301_v27 }
 0x234   :  { %v303_v29 = vrot.slane %v302_v28, 2 }
 0x236   :  { %v304_v30 = vadd.f32 %v303_v29, %v302_v28 }
 0x238   :  { %v305_v31 = vrot.slane %v304_v30, 1 }
 0x23a   :  { %v306_v32 = vadd.f32 %v305_v31, %v304_v30 }
 0x23c   :  { %390 = vrcp.f32 %v306_v32  ;;  %v318_v36 = vand.u32 2147483648, %v306_v32  ;;  %v316_v38 = vand.u32 2147483647, %v306_v32  ;;  %vm312_vm3 = vweird.f32 %v306_v32 }
 0x23e   :  { %v319_v40 = vor.u32 1.1754944e-38, %v318_v36  ;;  %vm317_vm5 = vcmp.eq.f32.partialorder %v316_v38, 8.507059e+37 }
 0x242   :  { %v391_v33 = vpop.eup %390 }
 0x243   :  { %v308_v34 = vmul.f32 %v391_v33, %v306_v32  ;;  %vm313_vm2 = vweird.f32 %v391_v33 }
 0x244   :  { %vm314_vm4 = vmor %vm312_vm3, %vm313_vm2 }
 0x245   :  { %v309_v35 = vsub.f32 1.0, %v308_v34 }
 0x247   :  { %v310_v37 = vmul.f32 %v391_v33, %v309_v35 }
 0x249   :  { %v311_v39 = vadd.f32 %v391_v33, %v310_v37 }
 0x24b   :  { %v315_v41 = vsel %vm314_vm4, %v391_v33, %v311_v39 }
 0x24c   :  { %v320_v42 = vsel %vm317_vm5, %v319_v40, %v315_v41 }
 0x24d   :  { %v321_v43 = vmul.f32 %v389_v26, %v320_v42 }
 0x24f   :  { %322 = vst [vmem:[%s586_s7] sm:$0xff] %v321_v43 }

</bundles_post_ra>
